<compile_context>
chip_gen: v6e
topology: v6e:2x2x1
jax: 0.10.0
libtpu: 0.0.40
codegen_flags: <defaults>
</compile_context>

<pallas_src>
import functools

import numpy as np

import jax
import jax.numpy as jnp
from jax import lax
from jax.experimental import pallas as pl
from jax.experimental.pallas import tpu as pltpu


# ------------------ static separable interpolation operators ------------------ #

def _interp_matrix(out_size: int, in_size: int) -> np.ndarray:
    """1-D bilinear interpolation operator (out, in), align_corners=True."""
    if out_size == 1 or in_size == 1:
        src = np.zeros((out_size,), np.float64)
    else:
        src = np.arange(out_size, dtype=np.float64) * ((in_size - 1) / (out_size - 1))
    i0 = np.clip(np.floor(src).astype(np.int64), 0, in_size - 1)
    i1 = np.minimum(i0 + 1, in_size - 1)
    frac = (src - i0).astype(np.float32)
    m = np.zeros((out_size, in_size), np.float32)
    rows = np.arange(out_size)
    np.add.at(m, (rows, i0), 1.0 - frac)
    np.add.at(m, (rows, i1), frac)
    return m


# ------------------------------- fused kernel --------------------------------- #

def _fused_resize_norm_tanh_kernel(x_ref, mh_ref, mw_ref, gb_ref, o_ref, *,
                                   groups, eps):
    # x_ref : (1, gC, W_in, H_in)   original input, H/W pre-swapped by wrapper
    # mh_ref: (Th, H_in)            vertical interpolation rows for this tile
    # mw_ref: (W_out, W_in)         horizontal interpolation operator
    # gb_ref: (gC, 2)               packed [gamma | beta], replicated per group
    # o_ref : (1, gC, Th * W_out)   lane-dense output pixels
    gc = x_ref.shape[1]
    h_in = x_ref.shape[3]
    w_in = x_ref.shape[2]
    th = mh_ref.shape[0]
    w_out = mw_ref.shape[0]
    c = gc // groups
    tp = th * w_out

    x = x_ref[0].astype(jnp.float32)                        # (gC, W_in, H_in)

    # ---- bilinear resize (separable), batched over the gC channel rows ----
    # vertical: y[b, t, w] = sum_i Mh[t, i] * x_orig[b, i, w]
    mh = jnp.broadcast_to(mh_ref[...], (gc, th, h_in))
    y = lax.dot_general(mh, x, (((2,), (2,)), ((0,), (0,))),
                        preferred_element_type=jnp.float32)  # (gC, Th, W_in)
    # horizontal: y[b, t, p] = sum_w y[b, t, w] * Mw[p, w]
    mw = jnp.broadcast_to(mw_ref[...], (gc, w_out, w_in))
    y = lax.dot_general(y, mw, (((2,), (2,)), ((0,), (0,))),
                        preferred_element_type=jnp.float32)  # (gC, Th, W_out)
    y = y.reshape(gc, tp)                                    # lane-dense pixels

    # ---- per-group channel norm (LayerNorm over C at each pixel) + tanh ----
    gb = gb_ref[...].astype(jnp.float32)                     # (gC, 2)
    gamma = gb[:, 0:1]                                       # (gC, 1)
    beta = gb[:, 1:2]

    xc_parts, inv_parts = [], []
    for gi in range(groups):                                 # static, tiny loop
        xs = y[gi * c:(gi + 1) * c]                          # (C, Tp)
        mu = jnp.mean(xs, axis=0, keepdims=True)
        xc = xs - mu
        var = jnp.mean(xc * xc, axis=0, keepdims=True)       # biased, as layer_norm
        inv = lax.rsqrt(var + eps)
        xc_parts.append(xc)
        inv_parts.append(jnp.broadcast_to(inv, (c, tp)))
    if groups > 1:
        xc8 = jnp.concatenate(xc_parts, axis=0)              # (gC, Tp) packed
        inv8 = jnp.concatenate(inv_parts, axis=0)
    else:
        xc8, inv8 = xc_parts[0], inv_parts[0]

    o_ref[0] = jnp.tanh(xc8 * inv8 * gamma + beta).astype(o_ref.dtype)


# ------------------------------ tiling helpers --------------------------------- #

def _pick_batch_group(n: int, c: int, sublane_target: int = 8) -> int:
    """How many batch elements to fold into the channel/sublane axis."""
    if c >= sublane_target:
        return 1
    for g in range(min(n, sublane_target // c), 0, -1):
        if n % g == 0:
            return g
    return 1


def _pick_row_tile(h_out: int, w_out: int, gc: int, n_batch_blocks: int,
                   budget_bytes: int = 3 * 1024 * 1024) -> int:
    """Output-row tile: lane extent multiple of 128, bounded VMEM, >=2 blocks."""
    divs = [d for d in range(1, h_out + 1) if h_out % d == 0]
    legal = [d for d in divs
             if (d % 8 == 0 or d == h_out)                       # sublane rule
             and ((d * w_out) % 128 == 0 or d == h_out)          # lane rule
             and gc * d * w_out * 4 <= budget_bytes]             # f32 working set
    legal.sort(reverse=True)
    if not legal:
        # TODO(synk): pad Hout/Wout for awkward shapes; full extent is always legal.
        return h_out
    for target_blocks in (4, 2):                 # keep v7x's 2nd TensorCore busy
        for d in legal:
            if n_batch_blocks * (h_out // d) >= target_blocks:
                return d
    return legal[0]


# --------------------------------- wrapper ------------------------------------- #

def resize_norm_squash(x, out_size, weight, bias, eps: float = 1e-5):
    """ResizeNormSquash.forward: bilinear resize -> ChannelNorm -> tanh (fused)."""
    n, c, h_in, w_in = x.shape
    oh, ow = out_size
    p = oh * ow
    itemsize = jnp.dtype(x.dtype).itemsize

    g = _pick_batch_group(n, c)          # fold batches to fill 8 f32 sublanes
    gc = g * c
    nb = n // g

    th = _pick_row_tile(oh, ow, gc, nb)
    tp = th * ow
    grid = (nb, oh // th)

    # Static separable interpolation operators (host numpy -> tiny VMEM inputs).
    mh = jnp.asarray(_interp_matrix(oh, h_in))
    mw = jnp.asarray(_interp_matrix(ow, w_in))

    # Group batches on the channel axis and pre-swap H/W of the (tiny) input so
    # both in-kernel dots contract the minor-most dim of both operands.
    x_g = x.reshape(nb, gc, h_in, w_in).transpose(0, 1, 3, 2)   # (nb, gC, W_in, H_in)

    # Pack gamma/beta into one tiny VMEM input, replicated per batch group.
    gb = jnp.stack([jnp.tile(weight.astype(jnp.float32), g),
                    jnp.tile(bias.astype(jnp.float32), g)], axis=1)  # (gC, 2)

    total_out = n * c * p
    cost = pl.CostEstimate(
        flops=(2 * n * c * oh * w_in * h_in        # vertical resize matmul
               + 2 * n * c * p * w_in              # horizontal resize matmul
               + 9 * total_out),                   # norm + affine
        transcendentals=total_out + n * p,         # tanh per elem + rsqrt per pixel
        bytes_accessed=(n * c * h_in * w_in + total_out) * itemsize,
    )

    out = pl.pallas_call(
        functools.partial(_fused_resize_norm_tanh_kernel, groups=g, eps=float(eps)),
        out_shape=jax.ShapeDtypeStruct((nb, gc, p), x.dtype),
        grid=grid,
        in_specs=[
            pl.BlockSpec((1, gc, w_in, h_in), lambda i, j: (i, 0, 0, 0)),
            pl.BlockSpec((th, h_in), lambda i, j: (j, 0)),
            pl.BlockSpec((ow, w_in), lambda i, j: (0, 0)),
            pl.BlockSpec((gc, 2), lambda i, j: (0, 0)),
        ],
        out_specs=pl.BlockSpec((1, gc, tp), lambda i, j: (i, 0, j)),
        compiler_params=pltpu.CompilerParams(
            dimension_semantics=("parallel", "parallel"),
            vmem_limit_bytes=28 * 1024 * 1024),
        cost_estimate=cost,
    )(x_g, mh, mw, gb)

    return out.reshape(n, c, oh, ow)


# --------------------------------- reference ----------------------------------- #

def _reference(x, out_size, weight, bias, eps: float = 1e-5):
    """Pure-JAX reference: exact 2-tap bilinear lerp -> ChannelNorm -> tanh."""
    oh, ow = out_size
    n, c, h, w = x.shape
    xf = x.astype(jnp.float32)

    def lerp_axis(arr, out_len, in_len, axis):
        if out_len == 1 or in_len == 1:
            src = np.zeros((out_len,), np.float64)
        else:
            src = np.arange(out_len, dtype=np.float64) * ((in_len - 1) / (out_len - 1))
        i0 = np.clip(np.floor(src).astype(np.int32), 0, in_len - 1)
        i1 = np.minimum(i0 + 1, in_len - 1)
        frac = jnp.asarray((src - i0).astype(np.float32))
        shape = [1] * arr.ndim
        shape[axis] = out_len
        frac = frac.reshape(shape)
        lo = jnp.take(arr, jnp.asarray(i0), axis=axis)
        hi = jnp.take(arr, jnp.asarray(i1), axis=axis)
        return lo * (1.0 - frac) + hi * frac

    xr = lerp_axis(xf, oh, h, 2)
    xr = lerp_axis(xr, ow, w, 3)
    mean = xr.mean(axis=1, keepdims=True)
    var = ((xr - mean) ** 2).mean(axis=1, keepdims=True)
    y = (xr - mean) / jnp.sqrt(var + eps)
    y = (y * weight.reshape(1, c, 1, 1).astype(jnp.float32)
         + bias.reshape(1, c, 1, 1).astype(jnp.float32))
    return jnp.tanh(y).astype(x.dtype)


# ----------------------------------- main --------------------------------------- #

if __name__ == "__main__":
    key = jax.random.PRNGKey(0)
    kx, kw, kb = jax.random.split(key, 3)

    n, c, h, w = 2, 4, 16, 16            # NCHW, in_channels=4, in_shape=16
    out_size = (32, 32)                  # out_shape=32
    x = jax.random.normal(kx, (n, c, h, w), dtype=jnp.float32)
    weight = 1.0 + 0.1 * jax.random.normal(kw, (c,), dtype=jnp.float32)  # ChannelNorm gamma
    bias = 0.1 * jax.random.normal(kb, (c,), dtype=jnp.float32)          # ChannelNorm beta

    y = resize_norm_squash(x, out_size, weight, bias)
    y = jax.block_until_ready(y)

    y_ref = _reference(x, out_size, weight, bias)
    assert y.shape == (n, c) + out_size and y.dtype == x.dtype

    # Tolerance allows for MXU f32-via-bf16-pass behavior in the in-kernel resize
    # matmuls; genuine indexing/normalization bugs produce errors >> this bound.
    err = float(jnp.max(jnp.abs(y.astype(jnp.float32) - y_ref.astype(jnp.float32))))
    assert err < 2e-2, f"mismatch vs reference: max abs err {err}"

    print("KERNEL_OK")
</pallas_src>

<mosaic_0001>
module attributes {stable_mosaic.version = 11 : i64} {
  func.func @_fused_resize_norm_tanh_kernel(%arg0: i32, %arg1: i32, %arg2: memref<1x8x16x16xf32, #tpu.memory_space<vmem>>, %arg3: memref<8x16xf32, #tpu.memory_space<vmem>>, %arg4: memref<32x16xf32, #tpu.memory_space<vmem>>, %arg5: memref<8x2xf32, #tpu.memory_space<vmem>>, %arg6: memref<1x8x256xf32, #tpu.memory_space<vmem>>) attributes {dimension_semantics = [#tpu.dimension_semantics<parallel>, #tpu.dimension_semantics<parallel>], iteration_bounds = array<i64: 1, 4>, scalar_prefetch = 0 : i64, scratch_operands = 0 : i64, tpu.core_type = #tpu.core_type<tc>, window_params = [{transform_indices = @transform_0, window_bounds = array<i64: 1, 8, 16, 16>}, {transform_indices = @transform_1, window_bounds = array<i64: 8, 16>}, {pipeline_mode = #tpu.pipeline_mode<synchronous>, transform_indices = @transform_2, window_bounds = array<i64: 32, 16>}, {pipeline_mode = #tpu.pipeline_mode<synchronous>, transform_indices = @transform_3, window_bounds = array<i64: 8, 2>}, {transform_indices = @transform_4, window_bounds = array<i64: 1, 8, 256>}]} {
    %c0 = arith.constant 0 : index
    %c0_0 = arith.constant 0 : index
    %c0_1 = arith.constant 0 : index
    %c0_2 = arith.constant 0 : index
    %0 = vector.load %arg2[%c0, %c0_0, %c0_1, %c0_2] : memref<1x8x16x16xf32, #tpu.memory_space<vmem>>, vector<1x8x16x16xf32>
    %1 = vector.shape_cast %0 : vector<1x8x16x16xf32> to vector<8x16x16xf32>
    %c0_3 = arith.constant 0 : index
    %c0_4 = arith.constant 0 : index
    %2 = vector.load %arg3[%c0_3, %c0_4] : memref<8x16xf32, #tpu.memory_space<vmem>>, vector<8x16xf32>
    %3 = vector.shape_cast %2 : vector<8x16xf32> to vector<1x8x16xf32>
    %4 = vector.broadcast %3 : vector<1x8x16xf32> to vector<8x8x16xf32>
    %cst = arith.constant dense<0.000000e+00> : vector<8x8x16xf32>
    %5 = tpu.matmul %4, %1, %cst {dimension_numbers = #tpu.dot_dimension_numbers<[2], [2], [1], [1], [0, 0, 0, 1, 1, 1], [0], [0]>} : vector<8x8x16xf32>, vector<8x16x16xf32>, vector<8x8x16xf32> -> vector<8x8x16xf32>
    %c0_5 = arith.constant 0 : index
    %c0_6 = arith.constant 0 : index
    %6 = vector.load %arg4[%c0_5, %c0_6] : memref<32x16xf32, #tpu.memory_space<vmem>>, vector<32x16xf32>
    %7 = vector.shape_cast %6 : vector<32x16xf32> to vector<1x32x16xf32>
    %8 = vector.broadcast %7 : vector<1x32x16xf32> to vector<8x32x16xf32>
    %cst_7 = arith.constant dense<0.000000e+00> : vector<8x8x32xf32>
    %9 = tpu.matmul %5, %8, %cst_7 {dimension_numbers = #tpu.dot_dimension_numbers<[2], [2], [1], [1], [0, 0, 0, 1, 1, 1], [0], [0]>} : vector<8x8x16xf32>, vector<8x32x16xf32>, vector<8x8x32xf32> -> vector<8x8x32xf32>
    %10 = vector.shape_cast %9 : vector<8x8x32xf32> to vector<8x256xf32>
    %c0_8 = arith.constant 0 : index
    %c0_9 = arith.constant 0 : index
    %11 = vector.load %arg5[%c0_8, %c0_9] : memref<8x2xf32, #tpu.memory_space<vmem>>, vector<8x2xf32>
    %12 = vector.extract_strided_slice %11 {offsets = [0, 0], sizes = [8, 1], strides = [1, 1]} : vector<8x2xf32> to vector<8x1xf32>
    %13 = vector.extract_strided_slice %11 {offsets = [0, 1], sizes = [8, 1], strides = [1, 1]} : vector<8x2xf32> to vector<8x1xf32>
    %14 = vector.extract_strided_slice %10 {offsets = [0, 0], sizes = [4, 256], strides = [1, 1]} : vector<8x256xf32> to vector<4x256xf32>
    %cst_10 = arith.constant dense<0.000000e+00> : vector<256xf32>
    %15 = vector.multi_reduction <add>, %14, %cst_10 [0] : vector<4x256xf32> to vector<256xf32>
    %16 = vector.shape_cast %15 : vector<256xf32> to vector<1x256xf32>
    %cst_11 = arith.constant 4.000000e+00 : f32
    %17 = vector.broadcast %cst_11 : f32 to vector<1x256xf32>
    %18 = arith.divf %16, %17 : vector<1x256xf32>
    %19 = vector.broadcast %18 : vector<1x256xf32> to vector<4x256xf32>
    %20 = arith.subf %14, %19 : vector<4x256xf32>
    %21 = arith.mulf %20, %20 : vector<4x256xf32>
    %cst_12 = arith.constant dense<0.000000e+00> : vector<256xf32>
    %22 = vector.multi_reduction <add>, %21, %cst_12 [0] : vector<4x256xf32> to vector<256xf32>
    %23 = vector.shape_cast %22 : vector<256xf32> to vector<1x256xf32>
    %cst_13 = arith.constant 4.000000e+00 : f32
    %24 = vector.broadcast %cst_13 : f32 to vector<1x256xf32>
    %25 = arith.divf %23, %24 : vector<1x256xf32>
    %cst_14 = arith.constant 9.99999974E-6 : f32
    %26 = vector.broadcast %cst_14 : f32 to vector<1x256xf32>
    %27 = arith.addf %25, %26 : vector<1x256xf32>
    %28 = math.rsqrt %27 : vector<1x256xf32>
    %29 = vector.shape_cast %28 : vector<1x256xf32> to vector<1x256xf32>
    %30 = vector.broadcast %29 : vector<1x256xf32> to vector<4x256xf32>
    %31 = vector.extract_strided_slice %10 {offsets = [4, 0], sizes = [4, 256], strides = [1, 1]} : vector<8x256xf32> to vector<4x256xf32>
    %cst_15 = arith.constant dense<0.000000e+00> : vector<256xf32>
    %32 = vector.multi_reduction <add>, %31, %cst_15 [0] : vector<4x256xf32> to vector<256xf32>
    %33 = vector.shape_cast %32 : vector<256xf32> to vector<1x256xf32>
    %cst_16 = arith.constant 4.000000e+00 : f32
    %34 = vector.broadcast %cst_16 : f32 to vector<1x256xf32>
    %35 = arith.divf %33, %34 : vector<1x256xf32>
    %36 = vector.broadcast %35 : vector<1x256xf32> to vector<4x256xf32>
    %37 = arith.subf %31, %36 : vector<4x256xf32>
    %38 = arith.mulf %37, %37 : vector<4x256xf32>
    %cst_17 = arith.constant dense<0.000000e+00> : vector<256xf32>
    %39 = vector.multi_reduction <add>, %38, %cst_17 [0] : vector<4x256xf32> to vector<256xf32>
    %40 = vector.shape_cast %39 : vector<256xf32> to vector<1x256xf32>
    %cst_18 = arith.constant 4.000000e+00 : f32
    %41 = vector.broadcast %cst_18 : f32 to vector<1x256xf32>
    %42 = arith.divf %40, %41 : vector<1x256xf32>
    %cst_19 = arith.constant 9.99999974E-6 : f32
    %43 = vector.broadcast %cst_19 : f32 to vector<1x256xf32>
    %44 = arith.addf %42, %43 : vector<1x256xf32>
    %45 = math.rsqrt %44 : vector<1x256xf32>
    %46 = vector.shape_cast %45 : vector<1x256xf32> to vector<1x256xf32>
    %47 = vector.broadcast %46 : vector<1x256xf32> to vector<4x256xf32>
    %48 = tpu.concatenate %20, %37 in 0 : vector<4x256xf32>, vector<4x256xf32> -> vector<8x256xf32>
    %49 = tpu.concatenate %30, %47 in 0 : vector<4x256xf32>, vector<4x256xf32> -> vector<8x256xf32>
    %50 = arith.mulf %48, %49 : vector<8x256xf32>
    %51 = vector.broadcast %12 : vector<8x1xf32> to vector<8x256xf32>
    %52 = arith.mulf %50, %51 : vector<8x256xf32>
    %53 = vector.broadcast %13 : vector<8x1xf32> to vector<8x256xf32>
    %54 = arith.addf %52, %53 : vector<8x256xf32>
    %55 = math.tanh %54 : vector<8x256xf32>
    %c0_20 = arith.constant 0 : index
    %c0_21 = arith.constant 0 : index
    %c0_22 = arith.constant 0 : index
    %56 = vector.load %arg6[%c0_20, %c0_21, %c0_22] : memref<1x8x256xf32, #tpu.memory_space<vmem>>, vector<1x8x256xf32>
    %57 = vector.shape_cast %56 : vector<1x8x256xf32> to vector<8x256xf32>
    %58 = vector.shape_cast %55 : vector<8x256xf32> to vector<1x8x256xf32>
    tpu.vector_store %arg6[%c0_20, %c0_21, %c0_22], %58 {strides = array<i32>} : memref<1x8x256xf32, #tpu.memory_space<vmem>>, vector<1x8x256xf32>,
    return
  }
  func.func @transform_0(%arg0: i32, %arg1: i32) -> (i32, i32, i32, i32) {
    %c0_i32 = arith.constant 0 : i32
    %c0_i32_0 = arith.constant 0 : i32
    %c0_i32_1 = arith.constant 0 : i32
    %c0_i32_2 = arith.constant 0 : i32
    return %arg0, %c0_i32, %c0_i32_0, %c0_i32_1 : i32, i32, i32, i32
  }
  func.func @transform_1(%arg0: i32, %arg1: i32) -> (i32, i32) {
    %c0_i32 = arith.constant 0 : i32
    %c0_i32_0 = arith.constant 0 : i32
    return %arg1, %c0_i32 : i32, i32
  }
  func.func @transform_2(%arg0: i32, %arg1: i32) -> (i32, i32) {
    %c0_i32 = arith.constant 0 : i32
    %c0_i32_0 = arith.constant 0 : i32
    %c0_i32_1 = arith.constant 0 : i32
    return %c0_i32, %c0_i32_0 : i32, i32
  }
  func.func @transform_3(%arg0: i32, %arg1: i32) -> (i32, i32) {
    %c0_i32 = arith.constant 0 : i32
    %c0_i32_0 = arith.constant 0 : i32
    %c0_i32_1 = arith.constant 0 : i32
    return %c0_i32, %c0_i32_0 : i32, i32
  }
  func.func @transform_4(%arg0: i32, %arg1: i32) -> (i32, i32, i32) {
    %c0_i32 = arith.constant 0 : i32
    %c0_i32_0 = arith.constant 0 : i32
    return %arg0, %c0_i32, %arg1 : i32, i32, i32
  }
}

</mosaic_0001>

<bundles_post_ra>
// kernel: tpu_custom_call.1
= control target key start
LH: loop header
LB: loop body
LE: loop exit
PB: predicated region body
PF: predicated region fallthrough
CT: control target
= control target key end

     0   :  { %9 = vsyncpa [#allocation3], 0  ;;  %s2718_s0 = inlined_call_operand.hbm [shape: f32[1,8,16,16], index: 0, kind: input, shape index: {}]   ;;  %s2719_s1 = inlined_call_operand.vmem [shape: f32[32,16], index: 1, kind: input, shape index: {}]   ;;  %s2720_s2 = inlined_call_operand.vmem [shape: f32[32,16], index: 2, kind: input, shape index: {}]   ;;  %s2721_s3 = inlined_call_operand.vmem [shape: f32[8,2], index: 3, kind: input, shape index: {}]   ;;  %s2722_s4 = inlined_call_operand.hbm [shape: f32[1,8,1024], index: 4, kind: output, shape index: {}]  }
   0x1   :  { %10 = vsyncpa [#allocation4], 0 }
   0x2   :  { %12 = vsyncpa [#allocation4 + $0x1], 0  ;;  %s2373_s15 = smov 0   ;;  %s2375_s16 = smov 0  }
   0x3   :  { %s2377_s17 = smov 0   ;;  %s2379_s18 = smov 0  }
   0x4   :  { %s2381_s19 = smov 0   ;;  %s2383_s20 = smov 0  }
   0x5 LB: > { %s1848_s21 = sadd.s32 4294967295, %s2333_s20   ;;  %s1849_s22 = sadd.s32 4294967294, %s2333_s20   ;;  %s2333_s20 = sphi %s2383_s20, %s18_s20   ;;  %s2329_s19 = sphi %s2381_s19, %s2731_s19   ;;  %s2325_s18 = sphi %s2379_s18, %s2730_s18   ;;  %s2321_s17 = sphi %s2377_s17, %s2729_s17   ;;  %s2317_s16 = sphi %s2375_s16, %s2728_s16   ;;  %s2313_s15 = sphi %s2373_s15, %s2727_s15  }
   0x6   : > { %s27_s23 = sadd.s32 1, %s2329_s19  ;;  %s133_s24 = sadd.s32 1, %s2321_s17 }
   0x7   : > { %p28_p0 = scmp.ge.s32.totalorder %s27_s23, 4  ;;  %p143_p1 = scmp.ne.s32.totalorder %s2321_s17, %s2317_s16 }
   0x8   : > { %p144_p2 = scmp.eq.s32.totalorder %s1848_s21, 3  ;;  %p149_p3 = scmp.ne.s32.totalorder %s2317_s16, %s2313_s15 }
   0x9   : > { %s2733_s23 = smov (%p28_p0, %s27_s23), 0  ;;  %p150_p5 = scmp.eq.s32.totalorder %s1849_s22, 3 }
   0xa   : > { %p2413_p4 = por %p144_p2, %p143_p1  ;;  %s129_s26 = ssub.s32 %s2329_s19, %s2733_s23 }
   0xb   : > { %p1850_p6 = scmp.ge.s32.totalorder %s2333_s20, 1  ;;  %p131_p7 = scmp.eq.s32.totalorder %s129_s26, 0 }
   0xc   : > { %p2420_p8 = por %p150_p5, %p149_p3  ;;  %p157_p9 = scmp.lt.s32.totalorder %s2333_s20, 5 }
   0xd   : > { %s2426_s28 = scalar_select %p131_p7, %s2321_s17, %s133_s24  }
   0xe   : > { %p2428_p10 = pnand %p1850_p6, %p157_p9  ;;  %p2432_p11 = scmp.eq.s32.totalorder %s1848_s21, 0 }
   0xf   : > { %s2335_s5 = smov [#allocation2]  }
  0x10   : > { %p2141_p12 = pneg %p2428_p10  ;;  %s172_s6 = sshll.u32 %s2335_s5, 4  ;;  %s173_s6 = int_to_ptr.vmem [resolvable:$true] %s172_s6 }
  0x11   : > { %s2238_s7 = scalar_lea.vmem %s173_s6, 2048  ;;  %p2246_p5 = scmp.lt.s32.totalorder %s173_s6, %s173_s6 }
  0x12   : > { %p2142_p13 = pnand %p2432_p11, %p2141_p12  ;;  %p2239_p1 = scmp.ne.s32.totalorder %s173_s6, %s2238_s7 }
  0x13   : > { %p2247_p6 = scmp.lt.s32.totalorder %s2238_s7, %s2238_s7 }
  0x14   : > { %p2229_p0 = pneg %p2142_p13 }
  0x15   : > { %p2248_p7 = por %p2247_p6, %p2246_p5 }
  0x16   : > { %p2241_p2 = pnand %p2239_p1, %p2229_p0 }
  0x18   : > { %p2242_p3 = pneg %p2241_p2 }
  0x1a   : > { %p2249_p9 = pnand %p2248_p7, %p2242_p3 }
  0x1c   : > { %2252 = shalt.err (!%p2249_p9)
}
  0x1d   : > { %s2336_s8 = smov 128   ;;  %s2337_s9 = smov 8  }
  0x1e   : > { %2144 = dma.hbm_to_vmem [thread:$0]  (!%p2142_p13), %s2718_s0, 2048, %s173_s6, [#allocation3], %s2336_s8, %s2336_s8, %s2337_s9  }
  0x1f   : > { %201 = sbr.rel (%p2428_p10) target bundleno = 704 (0x2c0), region = 36 }
  0x24   : > { %2304 = dma.done.wait (%p2432_p11), [#allocation3], 2048  }
  0x25   : > { %2306 = vsyncadd (%p2432_p11), [#allocation3], 4294965248  ;;  %p226_p12 = scmp.lt.s32.totalorder %s2325_s18, 3  ;;  %v2338_v0 = vmov 0.0   ;;  %vm2339_vm0 = vmmov 0   ;;  %vm248_vm1 = vcmask 130048   ;;  %v1465_v52 = vlaneseq }
  0x26   : > { %1991 = vmatprep.subr.mxu0 %v2338_v0  ;;  %1998 = vmatprep.subr.mxu1 %v2338_v0  ;;  %v232_v1 = vld [vmem:[#allocation2 + $0x8] sm:$0xff]  ;;  %v234_v2 = vld [vmem:[#allocation2 + $0x18] sm:$0xff]  ;;  %v231_v3 = vld [vmem:[#allocation2] sm:$0xff]  ;;  %v2340_v38 = vmov 0   ;;  %v2341_v39 = vmov 1   ;;  %s2344_s9 = smov 64  }
  0x27   : > { %1995 = vmatprep.mubr.msk.f32.mxu0 %vm2339_vm0, %v2338_v0  ;;  %2002 = vmatprep.mubr.msk.f32.mxu1 %vm2339_vm0, %v2338_v0  ;;  %s227_s12 = scalar_select %p226_p12, %s2325_s18, 3  ;;  %v233_v4 = vld [vmem:[#allocation2 + $0x10] sm:$0xff]  ;;  %v236_v6 = vld [vmem:[#allocation2 + $0x28] sm:$0xff]  ;;  %v238_v7 = vld [vmem:[#allocation2 + $0x38] sm:$0xff]  ;;  %v2342_v50 = vmov 1983009808  }
  0x28   : > { %1992 = vmatpush3.xpose.msk.msra.mxu0 %vm248_vm1, %v232_v1  ;;  %1999 = vmatpush3.xpose.msk.msra.mxu1 %vm248_vm1, %v234_v2  ;;  %v235_v8 = vld [vmem:[#allocation2 + $0x20] sm:$0xff]  ;;  %v237_v9 = vld [vmem:[#allocation2 + $0x30] sm:$0xff]  ;;  %v240_v10 = vld [vmem:[#allocation2 + $0x48] sm:$0xff]  ;;  %v1463_v51 = vunpack.c.l.s4 %v2342_v50  ;;  %v1466_v56 = vshrl.u32 %v1465_v52, 7  ;;  %v2343_v60 = vmov 1934713408  }
  0x29   : > { %s1856_s13 = sshll.u32 %s227_s12, 3  ;;  %1993 = vmatprep.subr.mxu0 %v2338_v0  ;;  %2000 = vmatprep.subr.mxu1 %v2338_v0  ;;  %v242_v11 = vld [vmem:[#allocation2 + $0x58] sm:$0xff]  ;;  %v239_v12 = vld [vmem:[#allocation2 + $0x40] sm:$0xff]  ;;  %v241_v13 = vld [vmem:[#allocation2 + $0x50] sm:$0xff]  ;;  %v1527_v61 = vunpack.c.l.s4 %v2343_v60  ;;  %s2345_s10 = smov 32   ;;  %vm1620_vm2 = vcmask 261120  }
  0x2a   : > { %s229_s22 = scalar_lea.vmem %s2719_s1, %s1856_s13  ;;  %v244_v14 = vld [vmem:[#allocation2 + $0x68] sm:$0xff]  ;;  %v246_v15 = vld [vmem:[#allocation2 + $0x78] sm:$0xff]  ;;  %v243_v16 = vld [vmem:[#allocation2 + $0x60] sm:$0xff]  ;;  %2212 = vset.pattern.permute.xlu0 %v2340_v38  ;;  %2213 = vset.pattern.permute.xlu1 %v2341_v39  ;;  %v1464_v55 = vunpack.c.0.s8 %v1463_v51  ;;  %s2346_s11 = smov 96   ;;  %vm1622_vm3 = vcmask 523264   ;;  %vm1624_vm4 = vcmask 785408  }
  0x2b   : > { %v247_v5 = vld [vmem:[%s229_s22] sm:$0xff]  ;;  %v245_v17 = vld [vmem:[#allocation2 + $0x70] sm:$0xff]  ;;  %v2513_v18 = vld [vmem:[%s2720_s2 + $0x18] sm:$0xff]  ;;  %v1528_v2 = vunpack.c.0.s8 %v1527_v61  ;;  %vm1630_vm5 = vcmask 1043456   ;;  %s223_s14 = sand.u32 1, %s2317_s16   ;;  %s1926_s22 = sshll.u32 %s2325_s18, 8 }
  0x2c   : > { %1994 = vmatpush3.xpose.msk.msra.mxu0 %vm248_vm1, %v231_v3  ;;  %2001 = vmatpush3.xpose.msk.msra.mxu1 %vm248_vm1, %v233_v4  ;;  %v2526_v19 = vld [vmem:[%s2720_s2 + $0x10] sm:$0xff]  ;;  %v2541_v20 = vld [vmem:[%s2720_s2 + $0x8] sm:$0xff]  ;;  %v2552_v21 = vld [vmem:[%s2720_s2] sm:$0xff]  ;;  %v1467_v58 = vsub.s32 %v1464_v55, %v1466_v56  ;;  %s1855_s21 = sshll.u32 %s223_s14, 4  ;;  %s2672_s5 = scalar_lea.hbm %s2722_s4, %s1926_s22 }
  0x2d   : > { %2005 = vmatprep.subr.mxu0 %v2338_v0  ;;  %2012 = vmatprep.subr.mxu1 %v2338_v0  ;;  %s225_s24 = scalar_lea.vmem [#allocation5], %s1855_s21  ;;  %s1748_s6 = scalar_lea.sflag [#allocation4], %s223_s14 }
  0x2e   : > { %s1764_s26 = sshll.u32 %s225_s24, 4  ;;  %s2347_s18 = smov [#allocation5]   ;;  %s2674_s26 = int_to_ptr.vmem [resolvable:$true] %s1764_s26 }
  0x2f   : > { %1996 = vmatmul.mubr.msk.f32.vlgmr.msra.gmra.mxu0 %vm248_vm1, %v247_v5  ;;  %2003 = vmatmul.mubr.msk.f32.vlgmr.msra.gmra.mxu1 %vm248_vm1, %v247_v5  ;;  %s2253_s7 = scalar_lea.vmem %s2674_s26, 256  ;;  %s2257_s8 = sshll.u32 %s2347_s18, 4  ;;  %s2258_s8 = int_to_ptr.vmem [resolvable:$false] %s2257_s8 }
  0x30   : > { %2006 = vmatpush3.xpose.msk.msra.mxu0 %vm248_vm1, %v236_v6  ;;  %2013 = vmatpush3.xpose.msk.msra.mxu1 %vm248_vm1, %v238_v7  ;;  %p2254_p10 = scmp.ne.s32.totalorder %s2674_s26, %s2253_s7  ;;  %p2260_p0 = scmp.lt.s32.totalorder %s2674_s26, %s2258_s8 }
  0x31   : > { %2007 = vmatprep.subr.mxu0 %v2338_v0  ;;  %2014 = vmatprep.subr.mxu1 %v2338_v0 }
  0x32   : > { %2009 = vmatprep.mubr.msk.f32.mxu0 %vm2339_vm0, %v2338_v0  ;;  %2016 = vmatprep.mubr.msk.f32.mxu1 %vm2339_vm0, %v2338_v0  ;;  %p2255_p11 = pnand %p2254_p10, %p2413_p4 }
  0x34   : > { %2008 = vmatpush3.xpose.msk.msra.mxu0 %vm248_vm1, %v235_v8  ;;  %2015 = vmatpush3.xpose.msk.msra.mxu1 %vm248_vm1, %v237_v9  ;;  %p2256_p13 = pneg %p2255_p11 }
  0x35   : > { %2019 = vmatprep.subr.mxu0 %v2338_v0  ;;  %2026 = vmatprep.subr.mxu1 %v2338_v0 }
  0x37   : > { %2010 = vmatmul.mubr.msk.f32.vlgmr.msra.gmra.mxu0 %vm248_vm1, %v247_v5  ;;  %2017 = vmatmul.mubr.msk.f32.vlgmr.msra.gmra.mxu1 %vm248_vm1, %v247_v5 }
  0x38   : > { %2020 = vmatpush3.xpose.msk.msra.mxu0 %vm248_vm1, %v240_v10  ;;  %2027 = vmatpush3.xpose.msk.msra.mxu1 %vm248_vm1, %v242_v11 }
  0x39   : > { %2021 = vmatprep.subr.mxu0 %v2338_v0  ;;  %2028 = vmatprep.subr.mxu1 %v2338_v0 }
  0x3a   : > { %2023 = vmatprep.mubr.msk.f32.mxu0 %vm2339_vm0, %v2338_v0  ;;  %2030 = vmatprep.mubr.msk.f32.mxu1 %vm2339_vm0, %v2338_v0 }
  0x3c   : > { %2022 = vmatpush3.xpose.msk.msra.mxu0 %vm248_vm1, %v239_v12  ;;  %2029 = vmatpush3.xpose.msk.msra.mxu1 %vm248_vm1, %v241_v13 }
  0x3d   : > { %2033 = vmatprep.subr.mxu0 %v2338_v0  ;;  %2040 = vmatprep.subr.mxu1 %v2338_v0 }
  0x3f   : > { %2024 = vmatmul.mubr.msk.f32.vlgmr.msra.gmra.mxu0 %vm248_vm1, %v247_v5  ;;  %2031 = vmatmul.mubr.msk.f32.vlgmr.msra.gmra.mxu1 %vm248_vm1, %v247_v5 }
  0x40   : > { %2034 = vmatpush3.xpose.msk.msra.mxu0 %vm248_vm1, %v244_v14  ;;  %2041 = vmatpush3.xpose.msk.msra.mxu1 %vm248_vm1, %v246_v15  ;;  %v1531_v14 = vsub.s32 %v1528_v2, %v1466_v56 }
  0x41   : > { %2035 = vmatprep.subr.mxu0 %v2338_v0  ;;  %2042 = vmatprep.subr.mxu1 %v2338_v0 }
  0x42   : > { %2037 = vmatprep.mubr.msk.f32.mxu0 %vm2339_vm0, %v2338_v0  ;;  %2044 = vmatprep.mubr.msk.f32.mxu1 %vm2339_vm0, %v2338_v0 }
  0x44   : > { %2036 = vmatpush3.xpose.msk.msra.mxu0 %vm248_vm1, %v243_v16  ;;  %2043 = vmatpush3.xpose.msk.msra.mxu1 %vm248_vm1, %v245_v17 }
  0x45   : > { %2047 = vmatprep.subr.mxu0 %v2338_v0  ;;  %2058 = vmatprep.subr.mxu1 %v2338_v0 }
  0x47   : > { %2038 = vmatmul.mubr.msk.f32.vlgmr.msra.gmra.mxu0 %vm248_vm1, %v247_v5  ;;  %2045 = vmatmul.mubr.msk.f32.vlgmr.msra.gmra.mxu1 %vm248_vm1, %v247_v5 }
  0x48   : > { %2048 = vmatpush3.xpose.msk.msra.mxu0 %vm248_vm1, %v2513_v18  ;;  %2059 = vmatpush3.xpose.msk.msra.mxu1 %vm248_vm1, %v2513_v18 }
  0x49   : > { %2049 = vmatprep.subr.mxu0 %v2338_v0  ;;  %2060 = vmatprep.subr.mxu1 %v2338_v0 }
  0x4a   : > { %2055 = vmatprep.mubr.msk.f32.mxu0 %vm2339_vm0, %v2338_v0  ;;  %2066 = vmatprep.mubr.msk.f32.mxu1 %vm2339_vm0, %v2338_v0 }
  0x4c   : > { %2050 = vmatpush3.xpose.msk.msra.mxu0 %vm248_vm1, %v2526_v19  ;;  %2061 = vmatpush3.xpose.msk.msra.mxu1 %vm248_vm1, %v2526_v19 }
  0x4d   : > { %2051 = vmatprep.subr.mxu0 %v2338_v0  ;;  %2062 = vmatprep.subr.mxu1 %v2338_v0 }
  0x50   : > { %2052 = vmatpush3.xpose.msk.msra.mxu0 %vm248_vm1, %v2541_v20  ;;  %2063 = vmatpush3.xpose.msk.msra.mxu1 %vm248_vm1, %v2541_v20 }
  0x51   : > { %2053 = vmatprep.subr.mxu0 %v2338_v0  ;;  %2064 = vmatprep.subr.mxu1 %v2338_v0 }
  0x54   : > { %2054 = vmatpush3.xpose.msk.msra.mxu0 %vm248_vm1, %v2552_v21  ;;  %2065 = vmatpush3.xpose.msk.msra.mxu1 %vm248_vm1, %v2552_v21 }
  0x55   : > { %2069 = vmatprep.subr.mxu0 %v2338_v0  ;;  %2080 = vmatprep.subr.mxu1 %v2338_v0 }
  0xef   : > { %v324_v22 = vpop.f32.mrf.mxu0  ;;  %v400_v23 = vpop.f32.mrf.mxu1 }
  0xf0   : > { %2056 = vmatmul.mubr.msk.f32.vlgmr.msra.gmra.mxu0 %vm248_vm1, %v324_v22  ;;  %2067 = vmatmul.mubr.msk.f32.vlgmr.msra.gmra.mxu1 %vm248_vm1, %v400_v23 }
  0xf1   : > { %2070 = vmatpush3.xpose.msk.msra.mxu0 %vm248_vm1, %v2513_v18  ;;  %2081 = vmatpush3.xpose.msk.msra.mxu1 %vm248_vm1, %v2513_v18  ;;  %v1997_v24 = vpop.f32.mrf.mxu0  ;;  %v2004_v25 = vpop.f32.mrf.mxu1 }
  0xf2   : > { %2071 = vmatprep.subr.mxu0 %v2338_v0  ;;  %2082 = vmatprep.subr.mxu1 %v2338_v0 }
  0xf3   : > { %2077 = vmatprep.mubr.msk.f32.mxu0 %vm2339_vm0, %v2338_v0  ;;  %2088 = vmatprep.mubr.msk.f32.mxu1 %vm2339_vm0, %v2338_v0 }
  0xf5   : > { %2072 = vmatpush3.xpose.msk.msra.mxu0 %vm248_vm1, %v2526_v19  ;;  %2083 = vmatpush3.xpose.msk.msra.mxu1 %vm248_vm1, %v2526_v19 }
  0xf6   : > { %2073 = vmatprep.subr.mxu0 %v2338_v0  ;;  %2084 = vmatprep.subr.mxu1 %v2338_v0 }
  0xf7   : > { %v476_v26 = vpop.f32.mrf.mxu0  ;;  %v552_v27 = vpop.f32.mrf.mxu1 }
  0xf9   : > { %2074 = vmatpush3.xpose.msk.msra.mxu0 %vm248_vm1, %v2541_v20  ;;  %2085 = vmatpush3.xpose.msk.msra.mxu1 %vm248_vm1, %v2541_v20  ;;  %v2011_v28 = vpop.f32.mrf.mxu0  ;;  %v2018_v29 = vpop.f32.mrf.mxu1 }
  0xfa   : > { %2075 = vmatprep.subr.mxu0 %v2338_v0  ;;  %2086 = vmatprep.subr.mxu1 %v2338_v0 }
  0xfd   : > { %2076 = vmatpush3.xpose.msk.msra.mxu0 %vm248_vm1, %v2552_v21  ;;  %2087 = vmatpush3.xpose.msk.msra.mxu1 %vm248_vm1, %v2552_v21 }
  0xfe   : > { %2091 = vmatprep.subr.mxu0 %v2338_v0  ;;  %2102 = vmatprep.subr.mxu1 %v2338_v0 }
  0xff   : > { %v628_v30 = vpop.f32.mrf.mxu0  ;;  %v704_v31 = vpop.f32.mrf.mxu1 }
 0x100   : > { %2078 = vmatmul.mubr.msk.f32.vlgmr.msra.gmra.mxu0 %vm248_vm1, %v476_v26  ;;  %2089 = vmatmul.mubr.msk.f32.vlgmr.msra.gmra.mxu1 %vm248_vm1, %v552_v27 }
 0x101   : > { %2092 = vmatpush3.xpose.msk.msra.mxu0 %vm248_vm1, %v2513_v18  ;;  %2103 = vmatpush3.xpose.msk.msra.mxu1 %vm248_vm1, %v2513_v18  ;;  %v2025_v32 = vpop.f32.mrf.mxu0  ;;  %v2032_v33 = vpop.f32.mrf.mxu1 }
 0x102   : > { %2093 = vmatprep.subr.mxu0 %v2338_v0  ;;  %2104 = vmatprep.subr.mxu1 %v2338_v0 }
 0x103   : > { %2099 = vmatprep.mubr.msk.f32.mxu0 %vm2339_vm0, %v2338_v0  ;;  %2110 = vmatprep.mubr.msk.f32.mxu1 %vm2339_vm0, %v2338_v0 }
 0x105   : > { %2094 = vmatpush3.xpose.msk.msra.mxu0 %vm248_vm1, %v2526_v19  ;;  %2105 = vmatpush3.xpose.msk.msra.mxu1 %vm248_vm1, %v2526_v19 }
 0x106   : > { %2095 = vmatprep.subr.mxu0 %v2338_v0  ;;  %2106 = vmatprep.subr.mxu1 %v2338_v0 }
 0x107   : > { %v780_v34 = vpop.f32.mrf.mxu0  ;;  %v856_v35 = vpop.f32.mrf.mxu1 }
 0x109   : > { %2096 = vmatpush3.xpose.msk.msra.mxu0 %vm248_vm1, %v2541_v20  ;;  %2107 = vmatpush3.xpose.msk.msra.mxu1 %vm248_vm1, %v2541_v20  ;;  %v2039_v36 = vpop.f32.mrf.mxu0  ;;  %v2046_v37 = vpop.f32.mrf.mxu1 }
 0x10a   : > { %2097 = vmatprep.subr.mxu0 %v2338_v0  ;;  %2108 = vmatprep.subr.mxu1 %v2338_v0 }
 0x10d   : > { %2098 = vmatpush3.xpose.msk.msra.mxu0 %vm248_vm1, %v2552_v21  ;;  %2109 = vmatpush3.xpose.msk.msra.mxu1 %vm248_vm1, %v2552_v21 }
 0x10e   : > { %2113 = vmatprep.subr.mxu0 %v2338_v0  ;;  %2124 = vmatprep.subr.mxu1 %v2338_v0 }
 0x110   : > { %2100 = vmatmul.mubr.msk.f32.vlgmr.msra.gmra.mxu0 %vm248_vm1, %v628_v30  ;;  %2111 = vmatmul.mubr.msk.f32.vlgmr.msra.gmra.mxu1 %vm248_vm1, %v704_v31 }
 0x111   : > { %2114 = vmatpush3.xpose.msk.msra.mxu0 %vm248_vm1, %v2513_v18  ;;  %2125 = vmatpush3.xpose.msk.msra.mxu1 %vm248_vm1, %v2513_v18 }
 0x112   : > { %2115 = vmatprep.subr.mxu0 %v2338_v0  ;;  %2126 = vmatprep.subr.mxu1 %v2338_v0 }
 0x113   : > { %2121 = vmatprep.mubr.msk.f32.mxu0 %vm2339_vm0, %v2338_v0  ;;  %2132 = vmatprep.mubr.msk.f32.mxu1 %vm2339_vm0, %v2338_v0 }
 0x115   : > { %2116 = vmatpush3.xpose.msk.msra.mxu0 %vm248_vm1, %v2526_v19  ;;  %2127 = vmatpush3.xpose.msk.msra.mxu1 %vm248_vm1, %v2526_v19 }
 0x116   : > { %2117 = vmatprep.subr.mxu0 %v2338_v0  ;;  %2128 = vmatprep.subr.mxu1 %v2338_v0 }
 0x119   : > { %2118 = vmatpush3.xpose.msk.msra.mxu0 %vm248_vm1, %v2541_v20  ;;  %2129 = vmatpush3.xpose.msk.msra.mxu1 %vm248_vm1, %v2541_v20 }
 0x11a   : > { %2119 = vmatprep.subr.mxu0 %v2338_v0  ;;  %2130 = vmatprep.subr.mxu1 %v2338_v0 }
 0x11d   : > { %2120 = vmatpush3.xpose.msk.msra.mxu0 %vm248_vm1, %v2552_v21  ;;  %2131 = vmatpush3.xpose.msk.msra.mxu1 %vm248_vm1, %v2552_v21 }
 0x120   : > { %2122 = vmatmul.mubr.msk.f32.vlgmr.msra.gmra.mxu0 %vm248_vm1, %v780_v34  ;;  %2133 = vmatmul.mubr.msk.f32.vlgmr.msra.gmra.mxu1 %vm248_vm1, %v856_v35 }
 0x1b0   : > { %v945_v40 = vpop.f32.mrf.mxu0  ;;  %v1018_v41 = vpop.f32.mrf.mxu1 }
 0x1b2   : > { %v2057_v42 = vpop.f32.mrf.mxu0  ;;  %v2068_v43 = vpop.f32.mrf.mxu1 }
 0x1b3   : > { %v1629_v43 = vld [vmem:[%s2721_s3] sm:$0xff] }
 0x1c0   : > { %v1091_v44 = vpop.f32.mrf.mxu0  ;;  %v1164_v45 = vpop.f32.mrf.mxu1 }
 0x1c1   : > { %v1460_v57 = vcombine.low %v945_v40, %v1091_v44  ;;  %v1476_v59 = vcombine.low %v1018_v41, %v1164_v45  ;;  %v1461_v62 = vcombine.high %v945_v40, %v1091_v44  ;;  %v1477_v63 = vcombine.high %v1018_v41, %v1164_v45 }
 0x1c2   : > { %v2079_v46 = vpop.f32.mrf.mxu0  ;;  %v2090_v47 = vpop.f32.mrf.mxu1 }
 0x1c3   : > { %v1468_v0 = vrot.slane %v1460_v57, %v1467_v58  ;;  %v1484_v1 = vrot.slane %v1476_v59, %v1467_v58  ;;  %v1475_v3 = vrot.slane %v1461_v62, %v1467_v58  ;;  %v1491_v4 = vrot.slane %v1477_v63, %v1467_v58 }
 0x1c5   : > { %v1525_v13 = vcombine.high %v1468_v0, %v1484_v1  ;;  %v1524_v15 = vcombine.low %v1468_v0, %v1484_v1  ;;  %v1540_v20 = vcombine.low %v1475_v3, %v1491_v4  ;;  %v1541_v25 = vcombine.high %v1475_v3, %v1491_v4 }
 0x1c7   : > { %v1539_v26 = vrot.slane %v1525_v13, %v1531_v14  ;;  %v1532_v28 = vrot.slane %v1524_v15, %v1531_v14  ;;  %v1548_v31 = vrot.slane %v1540_v20, %v1531_v14  ;;  %v1555_v37 = vrot.slane %v1541_v25, %v1531_v14 }
 0x1d0   : > { %v1237_v48 = vpop.f32.mrf.mxu0  ;;  %v1310_v49 = vpop.f32.mrf.mxu1 }
 0x1d2   : > { %v2101_v53 = vpop.f32.mrf.mxu0  ;;  %v2112_v54 = vpop.f32.mrf.mxu1 }
 0x1e0   : > { %v1383_v5 = vpop.f32.mrf.mxu0  ;;  %v1456_v6 = vpop.f32.mrf.mxu1 }
 0x1e1   : > { %v1492_v7 = vcombine.low %v1237_v48, %v1383_v5  ;;  %v1493_v8 = vcombine.high %v1237_v48, %v1383_v5  ;;  %v1508_v9 = vcombine.low %v1310_v49, %v1456_v6  ;;  %v1509_v10 = vcombine.high %v1310_v49, %v1456_v6 }
 0x1e2   : > { %v2123_v11 = vpop.f32.mrf.mxu0  ;;  %v2134_v12 = vpop.f32.mrf.mxu1 }
 0x1e3   : > { %v1500_v16 = vrot.slane %v1492_v7, %v1467_v58  ;;  %v1507_v17 = vrot.slane %v1493_v8, %v1467_v58  ;;  %v1516_v18 = vrot.slane %v1508_v9, %v1467_v58  ;;  %v1523_v19 = vrot.slane %v1509_v10, %v1467_v58 }
 0x1e5   : > { %v1572_v21 = vcombine.low %v1507_v17, %v1523_v19  ;;  %v1573_v22 = vcombine.high %v1507_v17, %v1523_v19  ;;  %v1557_v23 = vcombine.high %v1500_v16, %v1516_v18  ;;  %v1556_v24 = vcombine.low %v1500_v16, %v1516_v18 }
 0x1e7   : > { %v1571_v27 = vrot.slane %v1557_v23, %v1531_v14  ;;  %v1564_v29 = vrot.slane %v1556_v24, %v1531_v14  ;;  %v1580_v30 = vrot.slane %v1572_v21, %v1531_v14  ;;  %v1587_v35 = vrot.slane %v1573_v22, %v1531_v14 }
 0x1e9   : > { %v1590_v32 = vcombine.low %v1539_v26, %v1571_v27  ;;  %v1589_v33 = vcombine.high %v1532_v28, %v1564_v29  ;;  %v1588_v34 = vcombine.low %v1532_v28, %v1564_v29  ;;  %v1592_v36 = vcombine.low %v1548_v31, %v1580_v30 }
 0x1ea   : > { %v1594_v38 = vcombine.low %v1555_v37, %v1587_v35  ;;  %v1593_v40 = vcombine.high %v1548_v31, %v1580_v30  ;;  %v1595_v41 = vcombine.high %v1555_v37, %v1587_v35  ;;  %v1591_v42 = vcombine.high %v1539_v26, %v1571_v27 }
 0x1eb   : > { %1601 = vrot.lane.b32.xlu1 %v1590_v32, %s2344_s9  ;;  %1597 = vrot.lane.b32.xlu0 %v1589_v33, %s2345_s10 }
 0x1ef   : > { %1613 = vrot.lane.b32.xlu1 %v1594_v38, %s2344_s9  ;;  %1609 = vrot.lane.b32.xlu0 %v1593_v40, %s2345_s10  ;;  %s2259_s9 = scalar_lea.vmem %s2258_s8, 512 }
 0x1f0   : > { %p2261_p1 = scmp.lt.s32.totalorder %s2259_s9, %s2253_s7 }
 0x1f2   : > { %p2262_p2 = por %p2261_p1, %p2260_p0 }
 0x1f3   : > { %1617 = vrot.lane.b32.xlu1 %v1595_v41, %s2346_s11  ;;  %1605 = vrot.lane.b32.xlu0 %v1591_v42, %s2346_s11 }
 0x1f4   : > { %p2263_p3 = pnand %p2262_p2, %p2256_p13 }
 0x1f7   : > { %1732 = vperm.xlu0 %2212, %v1629_v43   ;;  %1738 = vperm.xlu1 %2213, %v1629_v43  }
 0x1fb   : > { %2214 = vset.pattern.permute.xlu0 %v2341_v39 }
 0x25d   : > { %v1602_v44 = vpop.permute.xlu1 %1601  ;;  %v1598_v45 = vpop.permute.xlu0 %1597 }
 0x25e   : > { %v1621_v48 = vsel %vm1620_vm2, %v1588_v34, %v1598_v45 }
 0x25f   : > { %v1623_v53 = vsel %vm1622_vm3, %v1621_v48, %v1602_v44 }
 0x261   : > { %v1614_v46 = vpop.permute.xlu1 %1613  ;;  %v1610_v47 = vpop.permute.xlu0 %1609 }
 0x262   : > { %v1626_v49 = vsel %vm1620_vm2, %v1592_v36, %v1610_v47 }
 0x263   : > { %v1627_v51 = vsel %vm1622_vm3, %v1626_v49, %v1614_v46 }
 0x265   : > { %v1618_v50 = vpop.permute.xlu1 %1617  ;;  %v1606_v52 = vpop.permute.xlu0 %1605 }
 0x266   : > { %v1628_v54 = vsel %vm1624_vm4, %v1627_v51, %v1618_v50  ;;  %v1625_v55 = vsel %vm1624_vm4, %v1623_v53, %v1606_v52 }
 0x267   : > { %v1638_v56 = vsel %vm1630_vm5, %v1628_v54, 0.0  ;;  %v1675_v57 = vrot.slane %v1628_v54, 4  ;;  %v1631_v39 = vsel %vm1630_vm5, %v1625_v55, 0.0  ;;  %v1674_v58 = vrot.slane %v1625_v55, 4 }
 0x268   : > { %v1639_v59 = vrot.slane %v1638_v56, 4  ;;  %v1632_v60 = vrot.slane %v1631_v39, 4 }
 0x269   : > { %v1685_v61 = vsel %vm1630_vm5, %v1675_v57, 0.0  ;;  %v1678_v62 = vsel %vm1630_vm5, %v1674_v58, 0.0 }
 0x26a   : > { %v1640_v63 = vadd.f32 %v1639_v59, %v1638_v56  ;;  %v1686_v0 = vrot.slane %v1685_v61, 4  ;;  %v1633_v1 = vadd.f32 %v1632_v60, %v1631_v39  ;;  %v1679_v2 = vrot.slane %v1678_v62, 4 }
 0x26c   : > { %v1641_v3 = vrot.slane %v1640_v63, 2  ;;  %v1687_v4 = vadd.f32 %v1686_v0, %v1685_v61  ;;  %v1634_v5 = vrot.slane %v1633_v1, 2  ;;  %v1680_v6 = vadd.f32 %v1679_v2, %v1678_v62 }
 0x26e   : > { %v1642_v7 = vadd.f32 %v1641_v3, %v1640_v63  ;;  %v1688_v8 = vrot.slane %v1687_v4, 2  ;;  %v1635_v9 = vadd.f32 %v1634_v5, %v1633_v1  ;;  %v1681_v10 = vrot.slane %v1680_v6, 2 }
 0x270   : > { %v1643_v11 = vrot.slane %v1642_v7, 1  ;;  %v1689_v12 = vadd.f32 %v1688_v8, %v1687_v4  ;;  %v1636_v13 = vrot.slane %v1635_v9, 1  ;;  %v1682_v14 = vadd.f32 %v1681_v10, %v1680_v6 }
 0x272   : > { %v1644_v15 = vadd.f32 %v1643_v11, %v1642_v7  ;;  %v1690_v16 = vrot.slane %v1689_v12, 1  ;;  %v1637_v17 = vadd.f32 %v1636_v13, %v1635_v9  ;;  %v1683_v18 = vrot.slane %v1682_v14, 1  ;;  %v1733_v13 = vpop.permute.xlu0 %1732 }
 0x274   : > { %v1647_v19 = vmul.f32 0.25, %v1644_v15  ;;  %v1691_v20 = vadd.f32 %v1690_v16, %v1689_v12  ;;  %v1646_v21 = vmul.f32 0.25, %v1637_v17  ;;  %v1684_v22 = vadd.f32 %v1683_v18, %v1682_v14  ;;  %v1739_v18 = vpop.permute.xlu1 %1738 }
 0x276   : > { %v1649_v23 = vsub.f32 %v1628_v54, %v1647_v19  ;;  %v1693_v24 = vmul.f32 0.25, %v1691_v20  ;;  %v1648_v25 = vsub.f32 %v1625_v55, %v1646_v21  ;;  %v1692_v26 = vmul.f32 0.25, %v1684_v22 }
 0x278   : > { %v1651_v27 = vmul.f32 %v1649_v23, %v1649_v23  ;;  %v1695_v28 = vsub.f32 %v1628_v54, %v1693_v24  ;;  %v1650_v29 = vmul.f32 %v1648_v25, %v1648_v25  ;;  %v1694_v30 = vsub.f32 %v1625_v55, %v1692_v26 }
 0x27a   : > { %v1659_v31 = vsel %vm1630_vm5, %v1651_v27, 0.0  ;;  %v1697_v32 = vmul.f32 %v1695_v28, %v1695_v28  ;;  %v1652_v33 = vsel %vm1630_vm5, %v1650_v29, 0.0  ;;  %v1696_v34 = vmul.f32 %v1694_v30, %v1694_v30 }
 0x27b   : > { %v1660_v35 = vrot.slane %v1659_v31, 4  ;;  %v1653_v36 = vrot.slane %v1652_v33, 4  ;;  %v1725_v11 = vsel %vm1630_vm5, %v1649_v23, %v1695_v28  ;;  %v1724_v15 = vsel %vm1630_vm5, %v1648_v25, %v1694_v30 }
 0x27c   : > { %v1701_v37 = vrot.slane %v1697_v32, 4  ;;  %v1700_v38 = vrot.slane %v1696_v34, 4 }
 0x27d   : > { %v1661_v40 = vadd.f32 %v1660_v35, %v1659_v31  ;;  %v1654_v41 = vadd.f32 %v1653_v36, %v1652_v33 }
 0x27e   : > { %v1711_v42 = vsel %vm1630_vm5, %v1701_v37, 0.0  ;;  %v1704_v43 = vsel %vm1630_vm5, %v1700_v38, 0.0 }
 0x27f   : > { %v1662_v44 = vrot.slane %v1661_v40, 2  ;;  %v1712_v45 = vrot.slane %v1711_v42, 4  ;;  %v1655_v46 = vrot.slane %v1654_v41, 2  ;;  %v1705_v47 = vrot.slane %v1704_v43, 4 }
 0x281   : > { %v1663_v48 = vadd.f32 %v1662_v44, %v1661_v40  ;;  %v1713_v49 = vadd.f32 %v1712_v45, %v1711_v42  ;;  %v1656_v50 = vadd.f32 %v1655_v46, %v1654_v41  ;;  %v1706_v51 = vadd.f32 %v1705_v47, %v1704_v43 }
 0x283   : > { %v1664_v52 = vrot.slane %v1663_v48, 1  ;;  %v1714_v53 = vrot.slane %v1713_v49, 2  ;;  %v1657_v54 = vrot.slane %v1656_v50, 1  ;;  %v1707_v55 = vrot.slane %v1706_v51, 2 }
 0x285   : > { %v1665_v56 = vadd.f32 %v1664_v52, %v1663_v48  ;;  %v1715_v57 = vadd.f32 %v1714_v53, %v1713_v49  ;;  %v1658_v39 = vadd.f32 %v1657_v54, %v1656_v50  ;;  %v1708_v58 = vadd.f32 %v1707_v55, %v1706_v51 }
 0x287   : > { %v1667_v59 = vmul.f32 0.25, %v1665_v56  ;;  %v1716_v60 = vrot.slane %v1715_v57, 1  ;;  %v1666_v61 = vmul.f32 0.25, %v1658_v39  ;;  %v1709_v62 = vrot.slane %v1708_v58, 1 }
 0x289   : > { %v1669_v63 = vadd.f32 1e-05, %v1667_v59  ;;  %v1717_v0 = vadd.f32 %v1716_v60, %v1715_v57  ;;  %v1710_v1 = vadd.f32 %v1709_v62, %v1708_v58  ;;  %v1668_v2 = vadd.f32 1e-05, %v1666_v61 }
 0x28b   : > { %v1719_v3 = vmul.f32 0.25, %v1717_v0  ;;  %v1718_v4 = vmul.f32 0.25, %v1710_v1  ;;  %2215 = vrsqrt.f32 %v1669_v63 }
 0x28c   : > { %2217 = vrsqrt.f32 %v1668_v2 }
 0x28d   : > { %v1721_v5 = vadd.f32 1e-05, %v1719_v3  ;;  %v1720_v6 = vadd.f32 1e-05, %v1718_v4 }
 0x28f   : > { %2219 = vrsqrt.f32 %v1721_v5 }
 0x290   : > { %2221 = vrsqrt.f32 %v1720_v6 }
 0x298   : > { %v2216_v7 = vpop.eup %2215 }
 0x299   : > { %v2218_v8 = vpop.eup %2217 }
 0x29c   : > { %v2220_v9 = vpop.eup %2219 }
 0x29d   : > { %v2222_v10 = vpop.eup %2221  ;;  %v1727_v12 = vsel %vm1630_vm5, %v2216_v7, %v2220_v9 }
 0x29e   : > { %v1729_v14 = vmul.f32 %v1727_v12, %v1725_v11  ;;  %v1726_v16 = vsel %vm1630_vm5, %v2218_v8, %v2222_v10 }
 0x29f   : > { %v1728_v17 = vmul.f32 %v1726_v16, %v1724_v15 }
 0x2a0   : > { %v1736_v19 = vmul.f32 %v1733_v13, %v1729_v14 }
 0x2a1   : > { %v1735_v20 = vmul.f32 %v1733_v13, %v1728_v17 }
 0x2a2   : > { %v1742_v21 = vadd.f32 %v1739_v18, %v1736_v19 }
 0x2a3   : > { %v1741_v22 = vadd.f32 %v1739_v18, %v1735_v20 }
 0x2a4   : > { %2223 = vtanh.f32 %v1742_v21 }
 0x2a5   : > { %2225 = vtanh.f32 %v1741_v22 }
 0x2b1   : > { %v2224_v23 = vpop.eup %2223 }
 0x2b2   : > { %v2226_v24 = vpop.eup %2225  ;;  %1746 = vst [vmem:[%s225_s24 + $0x8] sm:$0xff] %v2224_v23 }
 0x2b3   : > { %1745 = vst [vmem:[%s225_s24] sm:$0xff] %v2226_v24 }
 0x2b4   : > { %2266 = shalt.err (!%p2263_p3)
}
 0x2b5   : > { %s2267_s10 = scalar_lea.hbm %s2672_s5, 256  ;;  %s2271_s13 = scalar_lea.hbm %s2722_s4, 1024 }
 0x2b6   : > { %p2268_p5 = scmp.ne.s32.totalorder %s2672_s5, %s2267_s10  ;;  %p2272_p9 = scmp.lt.s32.totalorder %s2672_s5, %s2722_s4 }
 0x2b7   : > { %p2273_p12 = scmp.lt.s32.totalorder %s2271_s13, %s2267_s10 }
 0x2b8   : > { %p2269_p6 = pnand %p2268_p5, %p2413_p4 }
 0x2b9   : > { %p2274_p10 = por %p2273_p12, %p2272_p9 }
 0x2ba   : > { %p2270_p7 = pneg %p2269_p6 }
 0x2bc   : > { %p2275_p11 = pnand %p2274_p10, %p2270_p7 }
 0x2be   : > { %2278 = shalt.err (!%p2275_p11)
}
 0x2bf   : > { %2139 = dma.vmem_to_hbm [thread:$0]  (%p2413_p4), %s2674_s26, 256, %s2672_s5, %s1748_s6  }
 0x2c0 PF: > { %p2151_p13 = scmp.ge.s32.totalorder %s2333_s20, 2  ;;  %s1776_s22 = sand.u32 1, %s2313_s15  }
 0x2c1   : > { %s1777_s24 = scalar_lea.sflag [#allocation4], %s1776_s22 }
 0x2c2   : > { %p2146_p0 = pnand %p2151_p13, %p2420_p8 }
 0x2c4   : > { %p2147_p1 = pneg %p2146_p0 }
 0x2c6   : > { %2308 = dma.done.wait (%p2147_p1), %s1777_s24, 256  }
 0x2c7   : > { %2310 = vsyncadd (%p2147_p1), %s1777_s24, 4294967040  ;;  %s18_s20 = sadd.s32 1, %s2333_s20   ;;  %s2727_s15 = smov %s2317_s16 }
 0x2c8   : > { %p15_p2 = scmp.ge.s32.totalorder %s18_s20, 6   ;;  %s2728_s16 = smov %s2321_s17 }
 0x2c9   : > { %s2729_s17 = smov %s2426_s28  ;;  %s2730_s18 = smov %s2329_s19 }
 0x2ca   : > { %s2731_s19 = smov %s2733_s23  ;;  %17 = sbr.rel (!%p15_p2) target bundleno = 5 (0x5), region = 77 }
 0x2cf   :  { %1782 = vsyncpa [#allocation3], 1 }
 0x2d0   :  { %1784 = vsyncpa [#allocation3 + $0x1], 1 }
 0x2d1   :  { %1785 = vsyncpa [#allocation4], 1 }
 0x2d2   :  { %1787 = vsyncpa [#allocation4 + $0x1], 1 }

</bundles_post_ra>
